<compile_context>
chip_gen: v6e
topology: v6e:2x2x1
jax: 0.10.0
libtpu: 0.0.40
codegen_flags: <defaults>
</compile_context>

<pallas_src>
import functools

import numpy as np

import jax
import jax.numpy as jnp
from jax import lax
from jax.experimental import pallas as pl
from jax.experimental.pallas import tpu as pltpu


# ---------------------------------------------------------------------------
# BCE-sum kernel (tiled reduction, per-row-tile partials)
# ---------------------------------------------------------------------------
def _bce_sum_kernel(pred_ref, target_ref, o_ref, *, tile_rows, tile_cols,
                    n_rows, n_cols):
    r = pl.program_id(0)            # row-tile axis   ("parallel")
    c = pl.program_id(1)            # col-tile axis   ("arbitrary" reduction)

    p = pred_ref[...].astype(jnp.float32)
    x = target_ref[...].astype(jnp.float32)

    def bce_sum(pp, xx):
        # torch.nn.functional.binary_cross_entropy clamps the log terms at -100
        log_p = jnp.maximum(jnp.log(pp), -100.0)
        log_1mp = jnp.maximum(jnp.log1p(-pp), -100.0)
        return jnp.sum(-(xx * log_p + (1.0 - xx) * log_1mp))

    @pl.when(c == 0)
    def _():
        o_ref[...] = jnp.zeros_like(o_ref)

    row_partial = (n_rows % tile_rows) != 0     # static Python bools
    col_partial = (n_cols % tile_cols) != 0

    if not (row_partial or col_partial):
        # Fast path: no masking code emitted at all.
        o_ref[...] += bce_sum(p, x)
    else:
        preds = []
        if row_partial:
            preds.append(r == pl.num_programs(0) - 1)
        if col_partial:
            preds.append(c == pl.num_programs(1) - 1)
        is_edge = preds[0]
        for q in preds[1:]:
            is_edge = jnp.logical_or(is_edge, q)

        @pl.when(jnp.logical_not(is_edge))
        def _():
            # Interior tiles: no mask work.
            o_ref[...] += bce_sum(p, x)

        @pl.when(is_edge)
        def _():
            valid = None
            if row_partial:
                gr = (lax.broadcasted_iota(jnp.int32, (tile_rows, tile_cols), 0)
                      + r * tile_rows)
                valid = gr < n_rows
            if col_partial:
                gc = (lax.broadcasted_iota(jnp.int32, (tile_rows, tile_cols), 1)
                      + c * tile_cols)
                vc = gc < n_cols
                valid = vc if valid is None else jnp.logical_and(valid, vc)
            # p = x = 1 contributes exactly 0 to the BCE sum (incl. -100 clamp),
            # and the where() also neutralizes garbage/NaN in edge-block padding.
            pp = jnp.where(valid, p, 1.0)
            xx = jnp.where(valid, x, 1.0)
            o_ref[...] += bce_sum(pp, xx)


def _bce_sum(rebuild2d, origin2d, *, tile_budget_elems=None,
             vmem_limit_bytes=None):
    """Sum of element-wise BCE over a 2-D prediction/target pair."""
    assert rebuild2d.shape == origin2d.shape
    n_rows, n_cols = rebuild2d.shape

    # ---- hardware-derived budgets -----------------------------------------
    try:
        vmem_cap = int(pltpu.get_tpu_info().vmem_capacity_bytes)
    except Exception:                       # pragma: no cover - defensive
        vmem_cap = 64 * 1024 * 1024         # conservative (v7x-sized) default
    if tile_budget_elems is None:
        # ~1/16 of VMEM worth of f32 working set per input tile:
        #   v7x (64 MiB VMEM)    -> 1M elems (4 MiB f32 / 2 MiB bf16 DMA)
        #   v5e/v6e (128 MiB)    -> 2M elems (8 MiB f32 / 4 MiB bf16 DMA)
        tile_budget_elems = max(64 * 1024, (vmem_cap // 16) // 4)
    if vmem_limit_bytes is None:
        vmem_limit_bytes = min(vmem_cap * 3 // 4, 96 * 1024 * 1024)

    itemsize = min(jnp.dtype(rebuild2d.dtype).itemsize,
                   jnp.dtype(origin2d.dtype).itemsize)
    granule = 8 * max(1, 4 // itemsize)     # 8 rows f32 / 16 bf16 / 32 int8

    # ---- column tile (only kicks in for the non-lane-dense fallback view
    #      with a huge pixel axis; the canonical view is always 128 wide) ----
    rows_for_cols = max(1, min(granule, n_rows))
    max_cols = max(128, (tile_budget_elems // rows_for_cols) // 128 * 128)
    tile_cols = n_cols if n_cols <= max_cols else max_cols
    col_tiles = pl.cdiv(n_cols, tile_cols)

    # ---- row tile -----------------------------------------------------------
    rows_fit = max(granule, (tile_budget_elems // tile_cols) // granule * granule)
    tile_rows = n_rows if n_rows <= rows_fit else rows_fit
    row_tiles = pl.cdiv(n_rows, tile_rows)

    kernel = functools.partial(_bce_sum_kernel, tile_rows=tile_rows,
                               tile_cols=tile_cols, n_rows=n_rows,
                               n_cols=n_cols)

    n_elems = n_rows * n_cols
    cost = pl.CostEstimate(
        flops=8 * n_elems,
        transcendentals=2 * n_elems,
        bytes_accessed=(n_elems * (jnp.dtype(rebuild2d.dtype).itemsize
                                   + jnp.dtype(origin2d.dtype).itemsize)
                        + 4 * row_tiles))

    partials = pl.pallas_call(
        kernel,
        out_shape=jax.ShapeDtypeStruct((row_tiles, 1, 1), jnp.float32),
        grid=(row_tiles, col_tiles),
        in_specs=[
            pl.BlockSpec((tile_rows, tile_cols), lambda r, c: (r, c)),
            pl.BlockSpec((tile_rows, tile_cols), lambda r, c: (r, c)),
        ],
        out_specs=pl.BlockSpec((1, 1, 1), lambda r, c: (r, 0, 0)),
        compiler_params=pltpu.CompilerParams(
            dimension_semantics=("parallel", "arbitrary"),
            vmem_limit_bytes=int(vmem_limit_bytes)),
        cost_estimate=cost,
    )(rebuild2d, origin2d)
    return jnp.sum(partials)


# ---------------------------------------------------------------------------
# Forward pass (matches joint_vae_loss.forward)
# ---------------------------------------------------------------------------
def joint_vae_loss_forward(origin_data, rebuild_data, latent_paras, image_size,
                           gamma_cont=1.0, gamma_disc=1.0, C_cont=0.0,
                           C_disc=0.0):
    num_pixels = image_size ** 2
    total = int(np.prod(rebuild_data.shape))
    n_rows = total // num_pixels            # = B*C, matching .view(-1, num_pixels)

    # Shape-agnostic lane-dense 2-D view when possible (free reshape of
    # contiguous data); otherwise the reference (B*C, num_pixels) view.
    if total % 128 == 0:
        view = (total // 128, 128)
    else:
        view = (n_rows, num_pixels)
    rebuild2d = rebuild_data.reshape(view)
    origin2d = origin_data.reshape(view)

    # mean BCE over all elements * num_pixels  ==  sum / (B*C)
    # (per-channel-row normalization, exactly as the torch reference's
    #  .view(-1, num_pixels) implies)
    rebuild_error = _bce_sum(rebuild2d, origin2d) / jnp.float32(n_rows)

    # Tiny latent terms: plain JAX (XLA fuses them).
    cont_kl_error = jnp.float32(0.0)
    if 'cont' in latent_paras:
        mean, logvar = latent_paras['cont']
        mean = mean.astype(jnp.float32)
        logvar = logvar.astype(jnp.float32)
        kl = -0.5 * (1.0 + logvar - mean * mean - jnp.exp(logvar))
        # mean over dim 0, then sum over latent dims  ==  total_sum / batch
        cont_kl_error = jnp.sum(kl) / jnp.float32(mean.shape[0])

    disc_kl_error = jnp.float32(0.0)
    if 'disc' in latent_paras:
        total_disc = jnp.float32(0.0)
        for alpha in latent_paras['disc']:
            a = alpha.astype(jnp.float32)
            disc_dim = a.shape[-1]
            ent = jnp.sum(a * jnp.log(a + 1e-12)) / jnp.float32(a.shape[0])
            total_disc = total_disc + jnp.float32(np.log(disc_dim)) + ent
        disc_kl_error = total_disc

    return (rebuild_error
            + gamma_cont * jnp.abs(cont_kl_error - C_cont)
            + gamma_disc * jnp.abs(disc_kl_error - C_disc))


# ---------------------------------------------------------------------------
# Demo / correctness checks
# ---------------------------------------------------------------------------
def _bce_ref_sum(p, x):
    p = p.astype(jnp.float32)
    x = x.astype(jnp.float32)
    return jnp.sum(-(x * jnp.maximum(jnp.log(p), -100.0)
                     + (1.0 - x) * jnp.maximum(jnp.log1p(-p), -100.0)))


if __name__ == "__main__":
    key = jax.random.PRNGKey(0)
    keys = jax.random.split(key, 12)

    B, C, H, W = 2, 1, 16, 16          # image_size = 16 -> num_pixels = 256
    image_size = H
    latent_cont = 8
    disc_dims = (4, 6)

    # Targets / predictions must lie in [0, 1] (BCE semantics)
    origin_data = jax.random.uniform(keys[0], (B, C, H, W), dtype=jnp.float32)
    rebuild_data = jax.nn.sigmoid(
        jax.random.normal(keys[1], (B, C, H, W), dtype=jnp.float32))

    mean = jax.random.normal(keys[2], (B, latent_cont), dtype=jnp.float32) * 0.5
    logvar = jax.random.normal(keys[3], (B, latent_cont), dtype=jnp.float32) * 0.1
    alphas = [
        jax.nn.softmax(jax.random.normal(keys[4], (B, disc_dims[0]),
                                         dtype=jnp.float32), axis=-1),
        jax.nn.softmax(jax.random.normal(keys[5], (B, disc_dims[1]),
                                         dtype=jnp.float32), axis=-1),
    ]
    latent_paras = {'cont': (mean, logvar), 'disc': alphas}

    total = joint_vae_loss_forward(origin_data, rebuild_data, latent_paras,
                                   image_size, 1.0, 1.0, 0.0, 0.0)
    total = jax.block_until_ready(total)

    # Pure-JAX reference (same -100 log-clamp semantics as torch BCE).
    def _reference():
        p = rebuild_data.reshape(-1, image_size ** 2).astype(jnp.float32)
        x = origin_data.reshape(-1, image_size ** 2).astype(jnp.float32)
        bce = -(x * jnp.maximum(jnp.log(p), -100.0)
                + (1.0 - x) * jnp.maximum(jnp.log1p(-p), -100.0))
        rebuild_error = jnp.mean(bce) * (image_size ** 2)
        kl = -0.5 * (1.0 + logvar - mean ** 2 - jnp.exp(logvar))
        cont = jnp.sum(jnp.mean(kl, axis=0))
        disc = jnp.float32(0.0)
        for a in alphas:
            disc = disc + np.log(a.shape[-1]) + jnp.mean(
                jnp.sum(a * jnp.log(a + 1e-12), axis=1))
        return rebuild_error + jnp.abs(cont) + jnp.abs(disc)

    ref = jax.block_until_ready(_reference())
    assert np.allclose(np.asarray(total), np.asarray(ref),
                       rtol=1e-5, atol=1e-5), (total, ref)

    # --- Exercise the multi-row-tile + partial-last-row-tile (masked) path on
    #     the canonical 128-lane view, forced via a tiny element budget. ------
    pr = jax.random.uniform(keys[6], (36, 128), dtype=jnp.float32,
                            minval=0.01, maxval=0.99)
    xr = jax.random.uniform(keys[7], (36, 128), dtype=jnp.float32)
    got = jax.block_until_ready(_bce_sum(pr, xr, tile_budget_elems=2048))
    want = jax.block_until_ready(_bce_ref_sum(pr, xr))
    assert np.allclose(np.asarray(got), np.asarray(want),
                       rtol=1e-4, atol=1e-2), (got, want)

    # Same path with bf16 inputs (in-kernel cast + 16-row granule).
    pr16 = pr.astype(jnp.bfloat16)
    xr16 = xr.astype(jnp.bfloat16)
    got16 = jax.block_until_ready(_bce_sum(pr16, xr16, tile_budget_elems=2048))
    want16 = jax.block_until_ready(_bce_ref_sum(pr16, xr16))
    assert np.allclose(np.asarray(got16), np.asarray(want16),
                       rtol=1e-4, atol=1e-2), (got16, want16)

    # --- Exercise the fallback view with column tiling: both row and column
    #     edges are partial (rows 10 -> 8+2, cols 300 -> 128+128+44). ---------
    pf = jax.random.uniform(keys[8], (10, 300), dtype=jnp.float32,
                            minval=0.01, maxval=0.99)
    xf = jax.random.uniform(keys[9], (10, 300), dtype=jnp.float32)
    gotf = jax.block_until_ready(_bce_sum(pf, xf, tile_budget_elems=1024))
    wantf = jax.block_until_ready(_bce_ref_sum(pf, xf))
    assert np.allclose(np.asarray(gotf), np.asarray(wantf),
                       rtol=1e-4, atol=1e-2), (gotf, wantf)

    # TODO(synk): module attributes (self.rebuild_error etc.) are not cached;
    # the functional forward only returns the total loss.
    print("KERNEL_OK")
</pallas_src>

<mosaic_0001>
module attributes {stable_mosaic.version = 11 : i64} {
  func.func @_bce_sum_kernel(%arg0: i32, %arg1: i32, %arg2: memref<4x128xf32, #tpu.memory_space<vmem>>, %arg3: memref<4x128xf32, #tpu.memory_space<vmem>>, %arg4: memref<1x1x1xf32, #tpu.memory_space<vmem>>) attributes {dimension_semantics = [#tpu.dimension_semantics<parallel>, #tpu.dimension_semantics<arbitrary>], iteration_bounds = array<i64: 1, 1>, scalar_prefetch = 0 : i64, scratch_operands = 0 : i64, tpu.core_type = #tpu.core_type<tc>, window_params = [{transform_indices = @transform_0, window_bounds = array<i64: 4, 128>}, {transform_indices = @transform_1, window_bounds = array<i64: 4, 128>}, {transform_indices = @transform_2, window_bounds = array<i64: 1, 1, 1>}]} {
    %c0 = arith.constant 0 : index
    %c0_0 = arith.constant 0 : index
    %0 = vector.load %arg2[%c0, %c0_0] : memref<4x128xf32, #tpu.memory_space<vmem>>, vector<4x128xf32>
    %c0_1 = arith.constant 0 : index
    %c0_2 = arith.constant 0 : index
    %1 = vector.load %arg3[%c0_1, %c0_2] : memref<4x128xf32, #tpu.memory_space<vmem>>, vector<4x128xf32>
    %c0_i32 = arith.constant 0 : i32
    %2 = arith.cmpi eq, %arg1, %c0_i32 : i32
    %3 = arith.extui %2 : i1 to i32
    %c0_i32_3 = arith.constant 0 : i32
    %4 = arith.cmpi ne, %3, %c0_i32_3 : i32
    scf.if %4 {
      %cst_15 = arith.constant 0.000000e+00 : f32
      %28 = vector.broadcast %cst_15 : f32 to vector<1x1x1xf32>
      %c0_16 = arith.constant 0 : index
      %c0_17 = arith.constant 0 : index
      %c0_18 = arith.constant 0 : index
      %29 = vector.load %arg4[%c0_16, %c0_17, %c0_18] : memref<1x1x1xf32, #tpu.memory_space<vmem>>, vector<1x1x1xf32>
      tpu.vector_store %arg4[%c0_16, %c0_17, %c0_18], %28 {strides = array<i32>} : memref<1x1x1xf32, #tpu.memory_space<vmem>>, vector<1x1x1xf32>,
    } else {
    }
    %c0_4 = arith.constant 0 : index
    %c0_5 = arith.constant 0 : index
    %c0_6 = arith.constant 0 : index
    %5 = vector.load %arg4[%c0_4, %c0_5, %c0_6] : memref<1x1x1xf32, #tpu.memory_space<vmem>>, vector<1x1x1xf32>
    %6 = math.log %0 : vector<4x128xf32>
    %cst = arith.constant -1.000000e+02 : f32
    %7 = vector.broadcast %cst : f32 to vector<4x128xf32>
    %8 = arith.maximumf %6, %7 : vector<4x128xf32>
    %cst_7 = arith.constant 0.000000e+00 : f32
    %9 = vector.broadcast %cst_7 : f32 to vector<4x128xf32>
    %10 = arith.subf %9, %0 : vector<4x128xf32>
    %11 = math.log1p %10 : vector<4x128xf32>
    %cst_8 = arith.constant -1.000000e+02 : f32
    %12 = vector.broadcast %cst_8 : f32 to vector<4x128xf32>
    %13 = arith.maximumf %11, %12 : vector<4x128xf32>
    %14 = arith.mulf %1, %8 : vector<4x128xf32>
    %cst_9 = arith.constant 1.000000e+00 : f32
    %15 = vector.broadcast %cst_9 : f32 to vector<4x128xf32>
    %16 = arith.subf %15, %1 : vector<4x128xf32>
    %17 = arith.mulf %16, %13 : vector<4x128xf32>
    %18 = arith.addf %14, %17 : vector<4x128xf32>
    %cst_10 = arith.constant 0.000000e+00 : f32
    %19 = vector.broadcast %cst_10 : f32 to vector<4x128xf32>
    %20 = arith.subf %19, %18 : vector<4x128xf32>
    %21 = vector.shape_cast %20 : vector<4x128xf32> to vector<1x4x128xf32>
    %cst_11 = arith.constant dense<0.000000e+00> : vector<1xf32>
    %22 = vector.multi_reduction <add>, %21, %cst_11 [1, 2] : vector<1x4x128xf32> to vector<1xf32>
    %23 = vector.shape_cast %22 : vector<1xf32> to vector<1x1x1xf32>
    %24 = vector.extract %23[0, 0, 0] : f32 from vector<1x1x1xf32>
    %25 = vector.broadcast %24 : f32 to vector<1x1x1xf32>
    %26 = arith.addf %5, %25 : vector<1x1x1xf32>
    %c0_12 = arith.constant 0 : index
    %c0_13 = arith.constant 0 : index
    %c0_14 = arith.constant 0 : index
    %27 = vector.load %arg4[%c0_12, %c0_13, %c0_14] : memref<1x1x1xf32, #tpu.memory_space<vmem>>, vector<1x1x1xf32>
    tpu.vector_store %arg4[%c0_12, %c0_13, %c0_14], %26 {strides = array<i32>} : memref<1x1x1xf32, #tpu.memory_space<vmem>>, vector<1x1x1xf32>,
    return
  }
  func.func @transform_0(%arg0: i32, %arg1: i32) -> (i32, i32) {
    %c0_i32 = arith.constant 0 : i32
    return %arg0, %arg1 : i32, i32
  }
  func.func @transform_1(%arg0: i32, %arg1: i32) -> (i32, i32) {
    %c0_i32 = arith.constant 0 : i32
    return %arg0, %arg1 : i32, i32
  }
  func.func @transform_2(%arg0: i32, %arg1: i32) -> (i32, i32, i32) {
    %c0_i32 = arith.constant 0 : i32
    %c0_i32_0 = arith.constant 0 : i32
    %c0_i32_1 = arith.constant 0 : i32
    return %arg0, %c0_i32, %c0_i32_0 : i32, i32, i32
  }
}

</mosaic_0001>

<bundles_post_ra>
// kernel: tpu_custom_call.1
= control target key start
LH: loop header
LB: loop body
LE: loop exit
PB: predicated region body
PF: predicated region fallthrough
CT: control target
= control target key end

     0   :  { %7 = vsyncpa [#allocation3], 0  ;;  %s201_s0 = inlined_call_operand.hbm [shape: f32[4,128], index: 0, kind: input, shape index: {}]   ;;  %s202_s1 = inlined_call_operand.hbm [shape: f32[4,128], index: 1, kind: input, shape index: {}]   ;;  %s203_s2 = inlined_call_operand.hbm [shape: f32[1,1,1], index: 2, kind: output, shape index: {}]  }
   0x1   :  { %8 = vsyncpa [#allocation6], 0 }
   0x2   :  { %9 = vsyncpa [#allocation4], 0  ;;  %s171_s9 = smov [#allocation2]   ;;  %s172_s11 = smov [#allocation5]  }
   0x3   :  { %s16_s10 = sshll.u32 %s171_s9, 4  ;;  %s26_s12 = sshll.u32 %s172_s11, 4  ;;  %s17_s10 = int_to_ptr.vmem [resolvable:$true] %s16_s10  ;;  %s27_s12 = int_to_ptr.vmem [resolvable:$true] %s26_s12 }
   0x4   :  { %s113_s13 = scalar_lea.vmem %s17_s10, 64  ;;  %p118_p1 = scmp.lt.s32.totalorder %s17_s10, %s17_s10 }
   0x5   :  { %p114_p0 = scmp.ne.s32.totalorder %s17_s10, %s113_s13  ;;  %p119_p2 = scmp.lt.s32.totalorder %s113_s13, %s113_s13 }
   0x7   :  { %p120_p3 = por %p119_p2, %p118_p1 }
   0x9   :  { %p121_p4 = pnand %p120_p3, %p114_p0 }
   0xb   :  { %124 = shalt.err (!%p121_p4)
}
   0xc   :  { %19 = dma.hbm_to_vmem [thread:$0]  %s201_s0, 64, %s17_s10, [#allocation3]  }
   0xd   :  { %s133_s16 = scalar_lea.vmem %s27_s12, 64  ;;  %p138_p6 = scmp.lt.s32.totalorder %s27_s12, %s27_s12 }
   0xe   :  { %p134_p5 = scmp.ne.s32.totalorder %s27_s12, %s133_s16  ;;  %p139_p7 = scmp.lt.s32.totalorder %s133_s16, %s133_s16 }
  0x10   :  { %p140_p8 = por %p139_p7, %p138_p6 }
  0x12   :  { %p141_p9 = pnand %p140_p8, %p134_p5 }
  0x14   :  { %144 = shalt.err (!%p141_p9)
}
  0x15   :  { %29 = dma.hbm_to_vmem [thread:$0]  %s202_s1, 64, %s27_s12, [#allocation6]  }
  0x16   :  { %165 = dma.done.wait [#allocation3], 64  }
  0x17   :  { %166 = vsyncadd [#allocation3], 4294967232 }
  0x18   :  { %167 = dma.done.wait [#allocation6], 64  }
  0x19   :  { %168 = vsyncadd [#allocation6], 4294967232  ;;  %vm42_vm0 = vcmask 0   ;;  %v173_v0 = vmov 0.0   ;;  %v36_v1 = vld [vmem:[#allocation2] sm:$0xf] }
  0x1a   :  { %43 = vst.msk [vmem:[#allocation7] sm:$0x1] %vm42_vm0, %v173_v0  ;;  %101 = vlog2.f32 %v36_v1  ;;  %v48_v2 = vsub.f32 0.0, %v36_v1  ;;  %v37_v9 = vld [vmem:[#allocation5] sm:$0xf]  ;;  %vm64_vm2 = vcmask 1043456  }
  0x1b   :  { %v60_v14 = vsub.f32 1.0, %v37_v9  ;;  %s174_s0 = smov [#allocation7]  }
  0x1c   :  { %v49_v3 = vadd.f32 1.0, %v48_v2  ;;  %v52_v4 = vmul.f32 -0.5, %v48_v2  ;;  %v55_v7 = vand.u32 2147483647, %v48_v2  ;;  %s85_s1 = sshll.u32 %s174_s0, 4  ;;  %s86_s1 = int_to_ptr.vmem [resolvable:$true] %s85_s1 }
  0x1d   :  { %s145_s20 = scalar_lea.vmem %s86_s1, 16  ;;  %s149_s21 = scalar_lea.vmem %s86_s1, 32 }
  0x1e   :  { %103 = vlog2.f32 %v49_v3  ;;  %v53_v5 = vadd.f32 1.0, %v52_v4  ;;  %vm56_vm1 = vcmp.lt.f32.partialorder %v55_v7, 0.0004427343  ;;  %p146_p10 = scmp.ne.s32.totalorder %s86_s1, %s145_s20  ;;  %p150_p11 = scmp.lt.s32.totalorder %s86_s1, %s86_s1 }
  0x1f   :  { %p151_p12 = scmp.lt.s32.totalorder %s149_s21, %s145_s20 }
  0x20   :  { %v54_v10 = vmul.f32 %v53_v5, %v48_v2 }
  0x21   :  { %v44_v29 = vld [vmem:[#allocation7] sm:$0x1]  ;;  %p152_p13 = por %p151_p12, %p150_p11 }
  0x23   :  { %p153_p0 = pnand %p152_p13, %p146_p10 }
  0x27   :  { %v102_v6 = vpop.eup %101 }
  0x28   :  { %v46_v8 = vmul.f32 0.6931472, %v102_v6 }
  0x2a   :  { %v47_v12 = vmax.f32 %v46_v8, -100.0 }
  0x2b   :  { %v104_v11 = vpop.eup %103 }
  0x2c   :  { %v51_v13 = vmul.f32 0.6931472, %v104_v11  ;;  %v59_v17 = vmul.f32 %v47_v12, %v37_v9 }
  0x2e   :  { %v57_v15 = vsel %vm56_vm1, %v54_v10, %v51_v13 }
  0x2f   :  { %v58_v16 = vmax.f32 %v57_v15, -100.0 }
  0x31   :  { %v61_v18 = vmul.f32 %v60_v14, %v58_v16 }
  0x33   :  { %v62_v19 = vadd.f32 %v61_v18, %v59_v17 }
  0x35   :  { %v63_v20 = vsub.f32 0.0, %v62_v19 }
  0x37   :  { %v65_v21 = vsel %vm64_vm2, %v63_v20, 0.0 }
  0x38   :  { %66 = vadd.xlane.f32.xlu0 %v65_v21 }
  0xc1   :  { %v67_v22 = vpop.xlane.xlu0 %66 }
  0xc2   :  { %v68_v23 = vrot.slane %v67_v22, 4 }
  0xc4   :  { %v69_v24 = vadd.f32 %v68_v23, %v67_v22 }
  0xc6   :  { %v70_v25 = vrot.slane %v69_v24, 2 }
  0xc8   :  { %v71_v26 = vadd.f32 %v70_v25, %v69_v24 }
  0xca   :  { %v72_v27 = vrot.slane %v71_v26, 1 }
  0xcc   :  { %v73_v28 = vadd.f32 %v72_v27, %v71_v26 }
  0xce   :  { %95 = vpush %v73_v28 }
  0xff   :  { %s96_s19 = spop %95 }
 0x100   :  { %v75_v30 = vstv %s96_s19 }
 0x101   :  { %v76_v31 = vadd.f32 %v75_v30, %v44_v29 }
 0x103   :  { %78 = vst.msk [vmem:[#allocation7] sm:$0x1] %vm42_vm0, %v76_v31 }
 0x104   :  { %156 = shalt.err (!%p153_p0)
}
 0x105   :  { %88 = dma.vmem_to_hbm [thread:$0]  %s86_s1, 16, %s203_s2, [#allocation4]  }
 0x106   :  { %169 = dma.done.wait [#allocation4], 16  }
 0x107   :  { %170 = vsyncadd [#allocation4], 4294967280 }
 0x108   :  { %92 = vsyncpa [#allocation3], 1 }
 0x109   :  { %93 = vsyncpa [#allocation6], 1 }
 0x10a   :  { %94 = vsyncpa [#allocation4], 1 }

</bundles_post_ra>
